<compile_context>
chip_gen: v7x
topology: tpu7x:2x2x1
jax: 0.10.0
libtpu: 0.0.40
codegen_flags: <defaults>
</compile_context>

<pallas_src>
import functools

import jax
import jax.numpy as jnp
import numpy as np
from jax.experimental import pallas as pl
from jax.experimental.pallas import tpu as pltpu


def attention_kernel(x_ref, wq_ref, wk_ref, wv_ref, wp_ref, b_ref,
                     out_ref, *attn_refs, scale: float):
    """One batch element per grid step.

    x_ref:  (N, C)      f32 activations
    wq/wk/wv_ref: (H, C, Dh)  bf16 per-head projection weights
    wp_ref: (H, Dh, C)  bf16 per-head output-projection weights
    b_ref:  (1, C)      f32 projection bias
    out_ref: (N, C)     projected output
    attn_refs: optionally one (H, N, N) attention-map output
    """
    H, _, Dh = wq_ref.shape
    N, C = x_ref.shape

    # Narrow activations to bf16 at the MXU boundary only; broadcast over heads so all
    # head-wise matmuls are leading-batch 3-D dot_generals (MXU, f32 accumulation).
    xb = jnp.broadcast_to(x_ref[...].astype(jnp.bfloat16), (H, N, C))

    q = jnp.einsum('hnc,hcd->hnd', xb, wq_ref[...],
                   preferred_element_type=jnp.float32)          # (H, N, Dh) f32
    k = jnp.einsum('hnc,hcd->hnd', xb, wk_ref[...],
                   preferred_element_type=jnp.float32)
    v = jnp.einsum('hnc,hcd->hnd', xb, wv_ref[...],
                   preferred_element_type=jnp.float32)

    # Fold the (full-dim) scale into q once, then narrow to bf16 for the score matmul.
    qb = (q * scale).astype(jnp.bfloat16)
    kb = k.astype(jnp.bfloat16)
    vb = v.astype(jnp.bfloat16)

    # Scores for all heads in one batched matmul: (H, N, N), f32.
    s = jnp.einsum('hnd,hmd->hnm', qb, kb, preferred_element_type=jnp.float32)

    # torch softmax(dim=1) == softmax over the heads axis (axis 0 here).  All f32.
    m = jnp.max(s, axis=0, keepdims=True)
    e = jnp.exp(s - m)
    denom = jnp.sum(e, axis=0, keepdims=True)
    attn = e * pl.reciprocal(denom, approx=True)                 # (H, N, N) f32

    if attn_refs:                          # optional attention-map output
        attn_refs[0][...] = attn.astype(attn_refs[0].dtype)
    # attn_drop / proj_drop: identity in eval mode.

    # (attn @ v) per head, then the output projection done per-head and summed over
    # heads -- identical to transpose(1,2).reshape(N,C) followed by x_cat @ Wproj,
    # but without the head-concat relayout.
    o = jnp.einsum('hnm,hmd->hnd', attn.astype(jnp.bfloat16), vb,
                   preferred_element_type=jnp.float32)           # (H, N, Dh) f32
    y = jnp.einsum('hnd,hdc->hnc', o.astype(jnp.bfloat16), wp_ref[...],
                   preferred_element_type=jnp.float32)           # (H, N, C) f32
    out = jnp.sum(y, axis=0) + b_ref[...]                        # (N, C) f32
    out_ref[...] = out.astype(out_ref.dtype)


def attention_forward(x, wqkv_t, wproj_t, bproj, *, heads: int, scale: float,
                      return_attn: bool = True):
    """x: (B, N, C); wqkv_t: (C, 3C) = qkv.weight.T; wproj_t: (C, C) = proj.weight.T;
    bproj: (1, C) = proj.bias."""
    B, N, C = x.shape
    H = heads
    Dh = C // H
    out_dtype = x.dtype

    # --- weight prep (pure JAX, outside the kernel) --------------------------------
    # Split the fused QKV weight into per-head (H, C, Dh) blocks and the projection
    # weight into per-head (H, Dh, C) blocks.  Keep MXU weights in bf16 (halves their
    # HBM->VMEM DMA and VMEM residency; accumulation stays f32 in the kernel).
    bf16 = jnp.bfloat16
    wq = wqkv_t[:, 0 * C:1 * C].reshape(C, H, Dh).transpose(1, 0, 2).astype(bf16)
    wk = wqkv_t[:, 1 * C:2 * C].reshape(C, H, Dh).transpose(1, 0, 2).astype(bf16)
    wv = wqkv_t[:, 2 * C:3 * C].reshape(C, H, Dh).transpose(1, 0, 2).astype(bf16)
    wp = wproj_t.reshape(H, Dh, C).astype(bf16)
    bproj = bproj.astype(jnp.float32)

    kernel = functools.partial(attention_kernel, scale=scale)

    out_spec = pl.BlockSpec((pl.Squeezed(), N, C), lambda b: (b, 0, 0))
    out_sds = jax.ShapeDtypeStruct((B, N, C), out_dtype)
    if return_attn:
        out_shape = (out_sds, jax.ShapeDtypeStruct((B, H, N, N), jnp.float32))
        out_specs = (out_spec,
                     pl.BlockSpec((pl.Squeezed(), H, N, N), lambda b: (b, 0, 0, 0)))
    else:
        out_shape = (out_sds,)
        out_specs = (out_spec,)

    results = pl.pallas_call(
        kernel,
        out_shape=out_shape,
        grid=(B,),
        in_specs=[
            pl.BlockSpec((pl.Squeezed(), N, C), lambda b: (b, 0, 0)),  # x, one batch elem
            pl.BlockSpec((H, C, Dh), lambda b: (0, 0, 0)),             # wq (whole)
            pl.BlockSpec((H, C, Dh), lambda b: (0, 0, 0)),             # wk (whole)
            pl.BlockSpec((H, C, Dh), lambda b: (0, 0, 0)),             # wv (whole)
            pl.BlockSpec((H, Dh, C), lambda b: (0, 0, 0)),             # wproj per-head
            pl.BlockSpec((1, C), lambda b: (0, 0)),                    # proj bias
        ],
        out_specs=out_specs,
        compiler_params=pltpu.CompilerParams(dimension_semantics=("parallel",)),
    )(x, wq, wk, wv, wp, bproj)

    if return_attn:
        return results[0], results[1]
    return results[0]


def reference_forward(x, wqkv_t, wproj_t, bproj, *, heads: int, scale: float):
    """Pure-JAX f32 transcription of the PyTorch forward (typo fixed)."""
    B, N, C = x.shape
    H = heads
    Dh = C // H
    qkv = (x @ wqkv_t).reshape(B, N, 3, H, Dh).transpose(2, 0, 3, 1, 4)
    q, k, v = qkv[0], qkv[1], qkv[2]
    attn = jnp.einsum("bhnd,bhmd->bhnm", q, k) * scale
    attn = jax.nn.softmax(attn, axis=1)                  # dim=1 == heads axis
    o = jnp.einsum("bhnm,bhmd->bhnd", attn, v)
    o = o.transpose(0, 2, 1, 3).reshape(B, N, C)
    out = o @ wproj_t + bproj
    return out, attn


if __name__ == "__main__":
    # Small shapes consistent with the module: B=2, N=8 tokens, C=32 dim, 4 heads.
    B, N, C, H = 2, 8, 32, 4
    scale = C ** (-0.5)

    key = jax.random.PRNGKey(0)
    kx, kqkv, kp, kb = jax.random.split(key, 4)

    x = jax.random.normal(kx, (B, N, C), dtype=jnp.float32)
    # nn.Linear weights are (out, in); we pass transposed copies so the math is x @ W^T.
    w_qkv = jax.random.normal(kqkv, (3 * C, C), dtype=jnp.float32) * (1.0 / np.sqrt(C))
    w_proj = jax.random.normal(kp, (C, C), dtype=jnp.float32) * (1.0 / np.sqrt(C))
    b_proj = jax.random.normal(kb, (C,), dtype=jnp.float32) * 0.01

    wqkv_t = w_qkv.T                     # (C, 3C)
    wproj_t = w_proj.T                   # (C, C)
    bproj_2d = b_proj.reshape(1, C)      # (1, C)

    out, attn = attention_forward(x, wqkv_t, wproj_t, bproj_2d, heads=H, scale=scale,
                                  return_attn=True)
    out = jax.block_until_ready(out)
    attn = jax.block_until_ready(attn)

    ref_out, ref_attn = reference_forward(x, wqkv_t, wproj_t, bproj_2d, heads=H, scale=scale)
    # bf16 MXU operands (f32 accumulation / f32 softmax) => loosened tolerance.
    np.testing.assert_allclose(np.asarray(out), np.asarray(ref_out), rtol=2e-2, atol=2e-2)
    np.testing.assert_allclose(np.asarray(attn), np.asarray(ref_attn), rtol=2e-2, atol=2e-2)

    # Also exercise the attention-map-free path (no (B,H,N,N) HBM writeback).
    out_only = attention_forward(x, wqkv_t, wproj_t, bproj_2d, heads=H, scale=scale,
                                 return_attn=False)
    out_only = jax.block_until_ready(out_only)
    np.testing.assert_allclose(np.asarray(out_only), np.asarray(ref_out), rtol=2e-2, atol=2e-2)

    print("KERNEL_OK")
</pallas_src>

<mosaic_0001>
module attributes {stable_mosaic.version = 11 : i64} {
  func.func @attention_kernel(%arg0: i32, %arg1: memref<1x8x32xf32, #tpu.memory_space<vmem>>, %arg2: memref<4x32x8xbf16, #tpu.memory_space<vmem>>, %arg3: memref<4x32x8xbf16, #tpu.memory_space<vmem>>, %arg4: memref<4x32x8xbf16, #tpu.memory_space<vmem>>, %arg5: memref<4x8x32xbf16, #tpu.memory_space<vmem>>, %arg6: memref<1x32xf32, #tpu.memory_space<vmem>>, %arg7: memref<1x8x32xf32, #tpu.memory_space<vmem>>, %arg8: memref<1x4x8x8xf32, #tpu.memory_space<vmem>>) attributes {dimension_semantics = [#tpu.dimension_semantics<parallel>], iteration_bounds = array<i64: 2>, scalar_prefetch = 0 : i64, scratch_operands = 0 : i64, tpu.core_type = #tpu.core_type<tc>, window_params = [{transform_indices = @transform_0, window_bounds = array<i64: 1, 8, 32>}, {pipeline_mode = #tpu.pipeline_mode<synchronous>, transform_indices = @transform_1, window_bounds = array<i64: 4, 32, 8>}, {pipeline_mode = #tpu.pipeline_mode<synchronous>, transform_indices = @transform_2, window_bounds = array<i64: 4, 32, 8>}, {pipeline_mode = #tpu.pipeline_mode<synchronous>, transform_indices = @transform_3, window_bounds = array<i64: 4, 32, 8>}, {pipeline_mode = #tpu.pipeline_mode<synchronous>, transform_indices = @transform_4, window_bounds = array<i64: 4, 8, 32>}, {pipeline_mode = #tpu.pipeline_mode<synchronous>, transform_indices = @transform_5, window_bounds = array<i64: 1, 32>}, {transform_indices = @transform_6, window_bounds = array<i64: 1, 8, 32>}, {transform_indices = @transform_7, window_bounds = array<i64: 1, 4, 8, 8>}]} {
    %c0 = arith.constant 0 : index
    %c0_0 = arith.constant 0 : index
    %c0_1 = arith.constant 0 : index
    %0 = vector.load %arg1[%c0, %c0_0, %c0_1] : memref<1x8x32xf32, #tpu.memory_space<vmem>>, vector<1x8x32xf32>
    %1 = vector.shape_cast %0 : vector<1x8x32xf32> to vector<8x32xf32>
    %2 = arith.truncf %1 : vector<8x32xf32> to vector<8x32xbf16>
    %3 = vector.shape_cast %2 : vector<8x32xbf16> to vector<1x8x32xbf16>
    %4 = vector.broadcast %3 : vector<1x8x32xbf16> to vector<4x8x32xbf16>
    %c0_2 = arith.constant 0 : index
    %c0_3 = arith.constant 0 : index
    %c0_4 = arith.constant 0 : index
    %5 = vector.load %arg2[%c0_2, %c0_3, %c0_4] : memref<4x32x8xbf16, #tpu.memory_space<vmem>>, vector<4x32x8xbf16>
    "tpu.trace_start"() <{level = 10 : i32, message = "hnc,hcd->hnd"}> : () -> ()
    %cst = arith.constant dense<0.000000e+00> : vector<4x8x8xf32>
    %6 = tpu.matmul %4, %5, %cst {dimension_numbers = #tpu.dot_dimension_numbers<[2], [1], [1], [2], [0, 0, 0, 1, 1, 2], [0], [0]>} : vector<4x8x32xbf16>, vector<4x32x8xbf16>, vector<4x8x8xf32> -> vector<4x8x8xf32>
    "tpu.trace_stop"() : () -> ()
    %c0_5 = arith.constant 0 : index
    %c0_6 = arith.constant 0 : index
    %c0_7 = arith.constant 0 : index
    %7 = vector.load %arg3[%c0_5, %c0_6, %c0_7] : memref<4x32x8xbf16, #tpu.memory_space<vmem>>, vector<4x32x8xbf16>
    "tpu.trace_start"() <{level = 10 : i32, message = "hnc,hcd->hnd"}> : () -> ()
    %cst_8 = arith.constant dense<0.000000e+00> : vector<4x8x8xf32>
    %8 = tpu.matmul %4, %7, %cst_8 {dimension_numbers = #tpu.dot_dimension_numbers<[2], [1], [1], [2], [0, 0, 0, 1, 1, 2], [0], [0]>} : vector<4x8x32xbf16>, vector<4x32x8xbf16>, vector<4x8x8xf32> -> vector<4x8x8xf32>
    "tpu.trace_stop"() : () -> ()
    %c0_9 = arith.constant 0 : index
    %c0_10 = arith.constant 0 : index
    %c0_11 = arith.constant 0 : index
    %9 = vector.load %arg4[%c0_9, %c0_10, %c0_11] : memref<4x32x8xbf16, #tpu.memory_space<vmem>>, vector<4x32x8xbf16>
    "tpu.trace_start"() <{level = 10 : i32, message = "hnc,hcd->hnd"}> : () -> ()
    %cst_12 = arith.constant dense<0.000000e+00> : vector<4x8x8xf32>
    %10 = tpu.matmul %4, %9, %cst_12 {dimension_numbers = #tpu.dot_dimension_numbers<[2], [1], [1], [2], [0, 0, 0, 1, 1, 2], [0], [0]>} : vector<4x8x32xbf16>, vector<4x32x8xbf16>, vector<4x8x8xf32> -> vector<4x8x8xf32>
    "tpu.trace_stop"() : () -> ()
    %cst_13 = arith.constant 0.176776692 : f32
    %11 = vector.broadcast %cst_13 : f32 to vector<4x8x8xf32>
    %12 = arith.mulf %6, %11 : vector<4x8x8xf32>
    %13 = arith.truncf %12 : vector<4x8x8xf32> to vector<4x8x8xbf16>
    %14 = arith.truncf %8 : vector<4x8x8xf32> to vector<4x8x8xbf16>
    %15 = arith.truncf %10 : vector<4x8x8xf32> to vector<4x8x8xbf16>
    "tpu.trace_start"() <{level = 10 : i32, message = "hnd,hmd->hnm"}> : () -> ()
    %cst_14 = arith.constant dense<0.000000e+00> : vector<4x8x8xf32>
    %16 = tpu.matmul %13, %14, %cst_14 {dimension_numbers = #tpu.dot_dimension_numbers<[2], [2], [1], [1], [0, 0, 0, 1, 1, 1], [0], [0]>} : vector<4x8x8xbf16>, vector<4x8x8xbf16>, vector<4x8x8xf32> -> vector<4x8x8xf32>
    "tpu.trace_stop"() : () -> ()
    %cst_15 = arith.constant dense<0xFF800000> : vector<8x8xf32>
    %17 = vector.multi_reduction <maximumf>, %16, %cst_15 [0] : vector<4x8x8xf32> to vector<8x8xf32>
    %18 = vector.shape_cast %17 : vector<8x8xf32> to vector<1x8x8xf32>
    %19 = vector.broadcast %18 : vector<1x8x8xf32> to vector<4x8x8xf32>
    %20 = arith.subf %16, %19 : vector<4x8x8xf32>
    %21 = math.exp %20 : vector<4x8x8xf32>
    %cst_16 = arith.constant dense<0.000000e+00> : vector<8x8xf32>
    %22 = vector.multi_reduction <add>, %21, %cst_16 [0] : vector<4x8x8xf32> to vector<8x8xf32>
    %23 = vector.shape_cast %22 : vector<8x8xf32> to vector<1x8x8xf32>
    %24 = tpu.reciprocal %23 {approx = true} : vector<1x8x8xf32> -> vector<1x8x8xf32>
    %25 = vector.broadcast %24 : vector<1x8x8xf32> to vector<4x8x8xf32>
    %26 = arith.mulf %21, %25 : vector<4x8x8xf32>
    %c0_17 = arith.constant 0 : index
    %c0_18 = arith.constant 0 : index
    %c0_19 = arith.constant 0 : index
    %c0_20 = arith.constant 0 : index
    %27 = vector.load %arg8[%c0_17, %c0_18, %c0_19, %c0_20] : memref<1x4x8x8xf32, #tpu.memory_space<vmem>>, vector<1x4x8x8xf32>
    %28 = vector.shape_cast %27 : vector<1x4x8x8xf32> to vector<4x8x8xf32>
    %29 = vector.shape_cast %26 : vector<4x8x8xf32> to vector<1x4x8x8xf32>
    tpu.vector_store %arg8[%c0_17, %c0_18, %c0_19, %c0_20], %29 {strides = array<i32>} : memref<1x4x8x8xf32, #tpu.memory_space<vmem>>, vector<1x4x8x8xf32>,
    %30 = arith.truncf %26 : vector<4x8x8xf32> to vector<4x8x8xbf16>
    "tpu.trace_start"() <{level = 10 : i32, message = "hnm,hmd->hnd"}> : () -> ()
    %cst_21 = arith.constant dense<0.000000e+00> : vector<4x8x8xf32>
    %31 = tpu.matmul %30, %15, %cst_21 {dimension_numbers = #tpu.dot_dimension_numbers<[2], [1], [1], [2], [0, 0, 0, 1, 1, 2], [0], [0]>} : vector<4x8x8xbf16>, vector<4x8x8xbf16>, vector<4x8x8xf32> -> vector<4x8x8xf32>
    "tpu.trace_stop"() : () -> ()
    %32 = arith.truncf %31 : vector<4x8x8xf32> to vector<4x8x8xbf16>
    %c0_22 = arith.constant 0 : index
    %c0_23 = arith.constant 0 : index
    %c0_24 = arith.constant 0 : index
    %33 = vector.load %arg5[%c0_22, %c0_23, %c0_24] : memref<4x8x32xbf16, #tpu.memory_space<vmem>>, vector<4x8x32xbf16>
    "tpu.trace_start"() <{level = 10 : i32, message = "hnd,hdc->hnc"}> : () -> ()
    %cst_25 = arith.constant dense<0.000000e+00> : vector<4x8x32xf32>
    %34 = tpu.matmul %32, %33, %cst_25 {dimension_numbers = #tpu.dot_dimension_numbers<[2], [1], [1], [2], [0, 0, 0, 1, 1, 2], [0], [0]>} : vector<4x8x8xbf16>, vector<4x8x32xbf16>, vector<4x8x32xf32> -> vector<4x8x32xf32>
    "tpu.trace_stop"() : () -> ()
    %cst_26 = arith.constant dense<0.000000e+00> : vector<8x32xf32>
    %35 = vector.multi_reduction <add>, %34, %cst_26 [0] : vector<4x8x32xf32> to vector<8x32xf32>
    %c0_27 = arith.constant 0 : index
    %c0_28 = arith.constant 0 : index
    %36 = vector.load %arg6[%c0_27, %c0_28] : memref<1x32xf32, #tpu.memory_space<vmem>>, vector<1x32xf32>
    %37 = vector.broadcast %36 : vector<1x32xf32> to vector<8x32xf32>
    %38 = arith.addf %35, %37 : vector<8x32xf32>
    %c0_29 = arith.constant 0 : index
    %c0_30 = arith.constant 0 : index
    %c0_31 = arith.constant 0 : index
    %39 = vector.load %arg7[%c0_29, %c0_30, %c0_31] : memref<1x8x32xf32, #tpu.memory_space<vmem>>, vector<1x8x32xf32>
    %40 = vector.shape_cast %39 : vector<1x8x32xf32> to vector<8x32xf32>
    %41 = vector.shape_cast %38 : vector<8x32xf32> to vector<1x8x32xf32>
    tpu.vector_store %arg7[%c0_29, %c0_30, %c0_31], %41 {strides = array<i32>} : memref<1x8x32xf32, #tpu.memory_space<vmem>>, vector<1x8x32xf32>,
    return
  }
  func.func @transform_0(%arg0: i32) -> (i32, i32, i32) {
    %c0_i32 = arith.constant 0 : i32
    %c0_i32_0 = arith.constant 0 : i32
    %c0_i32_1 = arith.constant 0 : i32
    return %arg0, %c0_i32, %c0_i32_0 : i32, i32, i32
  }
  func.func @transform_1(%arg0: i32) -> (i32, i32, i32) {
    %c0_i32 = arith.constant 0 : i32
    %c0_i32_0 = arith.constant 0 : i32
    %c0_i32_1 = arith.constant 0 : i32
    %c0_i32_2 = arith.constant 0 : i32
    return %c0_i32, %c0_i32_0, %c0_i32_1 : i32, i32, i32
  }
  func.func @transform_2(%arg0: i32) -> (i32, i32, i32) {
    %c0_i32 = arith.constant 0 : i32
    %c0_i32_0 = arith.constant 0 : i32
    %c0_i32_1 = arith.constant 0 : i32
    %c0_i32_2 = arith.constant 0 : i32
    return %c0_i32, %c0_i32_0, %c0_i32_1 : i32, i32, i32
  }
  func.func @transform_3(%arg0: i32) -> (i32, i32, i32) {
    %c0_i32 = arith.constant 0 : i32
    %c0_i32_0 = arith.constant 0 : i32
    %c0_i32_1 = arith.constant 0 : i32
    %c0_i32_2 = arith.constant 0 : i32
    return %c0_i32, %c0_i32_0, %c0_i32_1 : i32, i32, i32
  }
  func.func @transform_4(%arg0: i32) -> (i32, i32, i32) {
    %c0_i32 = arith.constant 0 : i32
    %c0_i32_0 = arith.constant 0 : i32
    %c0_i32_1 = arith.constant 0 : i32
    %c0_i32_2 = arith.constant 0 : i32
    return %c0_i32, %c0_i32_0, %c0_i32_1 : i32, i32, i32
  }
  func.func @transform_5(%arg0: i32) -> (i32, i32) {
    %c0_i32 = arith.constant 0 : i32
    %c0_i32_0 = arith.constant 0 : i32
    %c0_i32_1 = arith.constant 0 : i32
    return %c0_i32, %c0_i32_0 : i32, i32
  }
  func.func @transform_6(%arg0: i32) -> (i32, i32, i32) {
    %c0_i32 = arith.constant 0 : i32
    %c0_i32_0 = arith.constant 0 : i32
    %c0_i32_1 = arith.constant 0 : i32
    return %arg0, %c0_i32, %c0_i32_0 : i32, i32, i32
  }
  func.func @transform_7(%arg0: i32) -> (i32, i32, i32, i32) {
    %c0_i32 = arith.constant 0 : i32
    %c0_i32_0 = arith.constant 0 : i32
    %c0_i32_1 = arith.constant 0 : i32
    %c0_i32_2 = arith.constant 0 : i32
    return %arg0, %c0_i32, %c0_i32_0, %c0_i32_1 : i32, i32, i32, i32
  }
}

</mosaic_0001>

<bundles_post_ra>
// kernel: tpu_custom_call.1
= control target key start
LH: loop header
LB: loop body
LE: loop exit
PB: predicated region body
PF: predicated region fallthrough
CT: control target
= control target key end

     0   :  { %13 = vsyncpa [#allocation3], 0  ;;  %s2629_s0 = inlined_call_operand.vmem [shape: f32[2,8,32], index: 0, kind: input, shape index: {}]   ;;  %s2630_s1 = inlined_call_operand.vmem [shape: bf16[4,32,8], index: 1, kind: input, shape index: {}]   ;;  %s2631_s2 = inlined_call_operand.vmem [shape: bf16[4,32,8], index: 2, kind: input, shape index: {}]   ;;  %s2632_s3 = inlined_call_operand.vmem [shape: bf16[4,32,8], index: 3, kind: input, shape index: {}]   ;;  %s2633_s4 = inlined_call_operand.vmem [shape: bf16[4,8,32], index: 4, kind: input, shape index: {}]   ;;  %s2634_s5 = inlined_call_operand.vmem [shape: f32[1,32], index: 5, kind: input, shape index: {}]   ;;  %s2635_s6 = inlined_call_operand.hbm [shape: f32[2,8,32], index: 6, kind: output, shape index: {0}]   ;;  %s2636_s7 = inlined_call_operand.hbm [shape: f32[2,4,8,8], index: 7, kind: output, shape index: {1}]  }
   0x1   :  { %15 = vsyncpa [#allocation3 + $0x1], 0 }
   0x2   :  { %16 = vsyncpa [#allocation5], 0 }
   0x3   :  { %18 = vsyncpa [#allocation5 + $0x1], 0  ;;  %s2239_s24 = smov 0   ;;  %s2241_s25 = smov 0  }
   0x4   :  { %s2243_s26 = smov 0   ;;  %s2245_s27 = smov 0  }
   0x5 LB: > { %s2260_s28 = sadd.s32 4294967295, %s2191_s27   ;;  %s1723_s29 = sadd.s32 4294967294, %s2191_s27   ;;  %s2191_s27 = sphi %s2245_s27, %s2642_s27   ;;  %s2187_s26 = sphi %s2243_s26, %s2641_s26   ;;  %s2183_s25 = sphi %s2241_s25, %s2640_s25   ;;  %s2179_s24 = sphi %s2239_s24, %s2639_s24  }
   0x6   : > { %s2264_s30 = sadd.s32 1, %s2191_s27   ;;  %s162_s8 = sadd.s32 1, %s2187_s26 }
   0x7   : > { %s159_s9 = ssub.s32 %s2191_s27, %s2264_s30  ;;  %p172_p0 = scmp.ne.s32.totalorder %s2187_s26, %s2183_s25 }
   0x8   : > { %p160_p1 = scmp.eq.s32.totalorder %s159_s9, 0  ;;  %p173_p2 = scmp.eq.s32.totalorder %s2260_s28, 1 }
   0x9   : > { %p178_p3 = scmp.ne.s32.totalorder %s2183_s25, %s2179_s24  ;;  %p179_p4 = scmp.eq.s32.totalorder %s1723_s29, 1 }
   0xa   : > { %s2275_s10 = scalar_select %p160_p1, %s2187_s26, %s162_s8  }
   0xb   : > { %p2277_p5 = por %p173_p2, %p172_p0  ;;  %p2281_p6 = por %p179_p4, %p178_p3 }
   0xc   : > { %p1726_p7 = scmp.ge.s32.totalorder %s2191_s27, 1  ;;  %p245_p8 = scmp.lt.s32.totalorder %s2191_s27, 3 }
   0xe   : > { %p246_p9 = pnand %p1726_p7, %p245_p8 }
   0xf   : > { %v2063_v0 = vld [vmem:[%s2630_s1] sm:$0xff] (!%p246_p9)   ;;  %v2193_v1 = vmov (!%p246_p9), 0.0   ;;  %v2064_v2 = vld [vmem:[%s2630_s1 + $0x10] sm:$0xff] (!%p246_p9)   ;;  %v2065_v3 = vld [vmem:[%s2630_s1 + $0x8] sm:$0xff] (!%p246_p9)   ;;  %vm2194_vm0 = vmmov (!%p246_p9), 0   ;;  %p281_p10 = scmp.lt.s32.totalorder (!%p246_p9), %s2260_s28, 1 }
  0x10   : > { %249 = sbr.rel (%p246_p9) target bundleno = 986 (0x3da), region = 44  ;;  %1847 = vmatprep.subr.bf16.mxu0 (!%p246_p9), %v2193_v1  ;;  %1855 = vmatprep.subr.bf16.mxu1 (!%p246_p9), %v2193_v1  ;;  %v2066_v4 = vld [vmem:[%s2630_s1 + $0x18] sm:$0xff] (!%p246_p9)   ;;  %v2067_v5 = vld [vmem:[%s2630_s1 + $0x20] sm:$0xff] (!%p246_p9)   ;;  %v2068_v6 = vld [vmem:[%s2630_s1 + $0x30] sm:$0xff] (!%p246_p9)   ;;  %vm316_vm1 = vcmask (!%p246_p9), 261120   ;;  %vm980_vm2 = vcmask (!%p246_p9), 64512  }
  0x11   : > { %1848 = vmatpush3.bf16.msra.mxu0 (!%p246_p9), %v2063_v0  ;;  %1851 = vmatprep.mubr.msk.bf16.mxu0 (!%p246_p9), %vm2194_vm0, %v2193_v1  ;;  %v2069_v9 = vld [vmem:[%s2630_s1 + $0x28] sm:$0xff] (!%p246_p9)   ;;  %v2070_v10 = vld [vmem:[%s2630_s1 + $0x38] sm:$0xff] (!%p246_p9)   ;;  %v2071_v11 = vld [vmem:[%s2631_s2] sm:$0xff] (!%p246_p9)   ;;  %vm1207_vm3 = vcmask (!%p246_p9), 1043456   ;;  %s2481_s29 = sand.u32 (!%p246_p9), 1, %s2183_s25   ;;  %s2195_s16 = smov (!%p246_p9), [#allocation4]  }
  0x12   : > { %1856 = vmatpush3.bf16.msra.mxu1 (!%p246_p9), %v2064_v2  ;;  %1849 = vmatprep.subr.bf16.mxu0 (!%p246_p9), %v2193_v1  ;;  %v2072_v12 = vld [vmem:[%s2631_s2 + $0x10] sm:$0xff] (!%p246_p9)   ;;  %v2073_v13 = vld [vmem:[%s2631_s2 + $0x8] sm:$0xff] (!%p246_p9)   ;;  %v2074_v14 = vld [vmem:[%s2631_s2 + $0x18] sm:$0xff] (!%p246_p9)   ;;  %s1728_s8 = sshll.u32 (!%p246_p9), %s2481_s29, 5  ;;  %s1603_s14 = scalar_lea.sflag (!%p246_p9), [#allocation5], %s2481_s29 }
  0x13   : > { %1857 = vmatprep.subr.bf16.mxu1 (!%p246_p9), %v2193_v1  ;;  %1859 = vmatprep.mubr.msk.bf16.mxu1 (!%p246_p9), %vm2194_vm0, %v2193_v1  ;;  %v2075_v15 = vld [vmem:[%s2631_s2 + $0x20] sm:$0xff] (!%p246_p9)   ;;  %v2076_v16 = vld [vmem:[%s2631_s2 + $0x30] sm:$0xff] (!%p246_p9)   ;;  %v2077_v17 = vld [vmem:[%s2631_s2 + $0x28] sm:$0xff] (!%p246_p9)   ;;  %s2488_s9 = scalar_lea.vmem (!%p246_p9), [#allocation4], %s1728_s8  ;;  %s2101_s17 = sshll.u32 (!%p246_p9), %s2195_s16, 4  ;;  %s2102_s17 = int_to_ptr.vmem [resolvable:$false] %s2101_s17 }
  0x14   : > { %v2078_v18 = vld [vmem:[%s2631_s2 + $0x38] sm:$0xff] (!%p246_p9)   ;;  %v2079_v19 = vld [vmem:[%s2632_s3] sm:$0xff] (!%p246_p9)   ;;  %v2080_v20 = vld [vmem:[%s2632_s3 + $0x10] sm:$0xff] (!%p246_p9)  }
  0x15   : > { %1850 = vmatpush3.bf16.msra.mxu0 (!%p246_p9), %v2065_v3  ;;  %v2081_v21 = vld [vmem:[%s2632_s3 + $0x8] sm:$0xff] (!%p246_p9)   ;;  %v2082_v22 = vld [vmem:[%s2632_s3 + $0x18] sm:$0xff] (!%p246_p9)   ;;  %v2083_v23 = vld [vmem:[%s2632_s3 + $0x20] sm:$0xff] (!%p246_p9)  }
  0x16   : > { %1858 = vmatpush3.bf16.msra.mxu1 (!%p246_p9), %v2066_v4  ;;  %1863 = vmatprep.subr.bf16.mxu0 (!%p246_p9), %v2193_v1  ;;  %v2084_v24 = vld [vmem:[%s2632_s3 + $0x30] sm:$0xff] (!%p246_p9)   ;;  %v2085_v25 = vld [vmem:[%s2632_s3 + $0x28] sm:$0xff] (!%p246_p9)   ;;  %v2086_v26 = vld [vmem:[%s2632_s3 + $0x38] sm:$0xff] (!%p246_p9)  }
  0x17   : > { %s282_s21 = scalar_select %p281_p10, %s2260_s28, 1  ;;  %1871 = vmatprep.subr.bf16.mxu1 %v2193_v1 }
  0x19   : > { %s1729_s22 = sshll.u32 %s282_s21, 3  ;;  %s1629_s21 = sshll.u32 %s2488_s9, 4  ;;  %s2542_s21 = int_to_ptr.vmem [resolvable:$true] %s1629_s21 }
  0x1a   : > { %s284_s13 = scalar_lea.vmem %s2629_s0, %s1729_s22  ;;  %s1786_s22 = sshll.u32 %s2260_s28, 9 }
  0x1b   : > { %v286_v7 = vld [vmem:[%s284_s13] sm:$0xff]  ;;  %s2547_s13 = scalar_lea.hbm %s2636_s7, %s1786_s22  ;;  %s2097_s15 = scalar_lea.vmem %s2542_s21, 512 }
  0x1c   : > { %v2320_v8 = vpack.c.bf16 %v286_v7, %v286_v7  ;;  %p2098_p11 = scmp.ne.s32.totalorder %s2542_s21, %s2097_s15  ;;  %p2104_p0 = scmp.lt.s32.totalorder %s2542_s21, %s2102_s17 }
  0x1e   : > { %1852 = vmatmul.mubr.msk.bf16.vlgmr.msra.gmra.mrb[0].mxu0 %vm316_vm1, %v2320_v8  ;;  %1860 = vmatmul.mubr.msk.bf16.vlgmr.msra.gmra.mrb[0].mxu1 %vm316_vm1, %v2320_v8  ;;  %p2099_p12 = pnand %p2098_p11, %p2277_p5 }
  0x1f   : > { %1864 = vmatpush3.bf16.msra.mxu0 %v2067_v5  ;;  %1872 = vmatpush3.bf16.msra.mxu1 %v2068_v6 }
  0x20   : > { %1865 = vmatprep.subr.bf16.mxu0 %v2193_v1  ;;  %1873 = vmatprep.subr.bf16.mxu1 %v2193_v1  ;;  %p2100_p13 = pneg %p2099_p12 }
  0x21   : > { %1867 = vmatprep.mubr.msk.bf16.mxu0 %vm2194_vm0, %v2193_v1  ;;  %1875 = vmatprep.mubr.msk.bf16.mxu1 %vm2194_vm0, %v2193_v1 }
  0x23   : > { %1866 = vmatpush3.bf16.msra.mxu0 %v2069_v9  ;;  %1874 = vmatpush3.bf16.msra.mxu1 %v2070_v10 }
  0x24   : > { %1879 = vmatprep.subr.bf16.mxu0 %v2193_v1  ;;  %1887 = vmatprep.subr.bf16.mxu1 %v2193_v1 }
  0x26   : > { %1868 = vmatmul.mubr.msk.bf16.vlgmr.msra.gmra.mrb[4].mxu0 %vm316_vm1, %v2320_v8  ;;  %1876 = vmatmul.mubr.msk.bf16.vlgmr.msra.gmra.mrb[4].mxu1 %vm316_vm1, %v2320_v8 }
  0x27   : > { %1880 = vmatpush3.bf16.msra.mxu0 %v2071_v11  ;;  %1888 = vmatpush3.bf16.msra.mxu1 %v2072_v12 }
  0x28   : > { %1881 = vmatprep.subr.bf16.mxu0 %v2193_v1  ;;  %1889 = vmatprep.subr.bf16.mxu1 %v2193_v1 }
  0x29   : > { %1883 = vmatprep.mubr.msk.bf16.mxu0 %vm2194_vm0, %v2193_v1  ;;  %1891 = vmatprep.mubr.msk.bf16.mxu1 %vm2194_vm0, %v2193_v1 }
  0x2b   : > { %1882 = vmatpush3.bf16.msra.mxu0 %v2073_v13  ;;  %1890 = vmatpush3.bf16.msra.mxu1 %v2074_v14 }
  0x2c   : > { %1895 = vmatprep.subr.bf16.mxu0 %v2193_v1  ;;  %1903 = vmatprep.subr.bf16.mxu1 %v2193_v1 }
  0x2e   : > { %1884 = vmatmul.mubr.msk.bf16.vlgmr.msra.gmra.mrb[8].mxu0 %vm316_vm1, %v2320_v8  ;;  %1892 = vmatmul.mubr.msk.bf16.vlgmr.msra.gmra.mrb[8].mxu1 %vm316_vm1, %v2320_v8 }
  0x2f   : > { %1896 = vmatpush3.bf16.msra.mxu0 %v2075_v15  ;;  %1904 = vmatpush3.bf16.msra.mxu1 %v2076_v16 }
  0x30   : > { %1897 = vmatprep.subr.bf16.mxu0 %v2193_v1  ;;  %1905 = vmatprep.subr.bf16.mxu1 %v2193_v1 }
  0x31   : > { %1899 = vmatprep.mubr.msk.bf16.mxu0 %vm2194_vm0, %v2193_v1  ;;  %1907 = vmatprep.mubr.msk.bf16.mxu1 %vm2194_vm0, %v2193_v1 }
  0x33   : > { %1898 = vmatpush3.bf16.msra.mxu0 %v2077_v17  ;;  %1906 = vmatpush3.bf16.msra.mxu1 %v2078_v18 }
  0x34   : > { %1911 = vmatprep.subr.bf16.mxu0 %v2193_v1  ;;  %1919 = vmatprep.subr.bf16.mxu1 %v2193_v1 }
  0x36   : > { %1900 = vmatmul.mubr.msk.bf16.vlgmr.msra.gmra.mrb[12].mxu0 %vm316_vm1, %v2320_v8  ;;  %1908 = vmatmul.mubr.msk.bf16.vlgmr.msra.gmra.mrb[12].mxu1 %vm316_vm1, %v2320_v8 }
  0x37   : > { %1912 = vmatpush3.bf16.msra.mxu0 %v2079_v19  ;;  %1920 = vmatpush3.bf16.msra.mxu1 %v2080_v20 }
  0x38   : > { %1913 = vmatprep.subr.bf16.mxu0 %v2193_v1  ;;  %1921 = vmatprep.subr.bf16.mxu1 %v2193_v1 }
  0x39   : > { %1915 = vmatprep.mubr.msk.bf16.mxu0 %vm2194_vm0, %v2193_v1  ;;  %1923 = vmatprep.mubr.msk.bf16.mxu1 %vm2194_vm0, %v2193_v1 }
  0x3b   : > { %1914 = vmatpush3.bf16.msra.mxu0 %v2081_v21  ;;  %1922 = vmatpush3.bf16.msra.mxu1 %v2082_v22 }
  0x3c   : > { %1927 = vmatprep.subr.bf16.mxu0 %v2193_v1  ;;  %1935 = vmatprep.subr.bf16.mxu1 %v2193_v1 }
  0x3e   : > { %1916 = vmatmul.mubr.msk.bf16.vlgmr.msra.gmra.mrb[16].mxu0 %vm316_vm1, %v2320_v8  ;;  %1924 = vmatmul.mubr.msk.bf16.vlgmr.msra.gmra.mrb[16].mxu1 %vm316_vm1, %v2320_v8 }
  0x3f   : > { %1928 = vmatpush3.bf16.msra.mxu0 %v2083_v23  ;;  %1936 = vmatpush3.bf16.msra.mxu1 %v2084_v24 }
  0x40   : > { %1929 = vmatprep.subr.bf16.mxu0 %v2193_v1  ;;  %1937 = vmatprep.subr.bf16.mxu1 %v2193_v1 }
  0x41   : > { %1931 = vmatprep.mubr.msk.bf16.mxu0 %vm2194_vm0, %v2193_v1  ;;  %1939 = vmatprep.mubr.msk.bf16.mxu1 %vm2194_vm0, %v2193_v1 }
  0x43   : > { %1930 = vmatpush3.bf16.msra.mxu0 %v2085_v25  ;;  %1938 = vmatpush3.bf16.msra.mxu1 %v2086_v26 }
  0x44   : > { %1943 = vmatprep.subr.bf16.mxu0 %v2193_v1  ;;  %1949 = vmatprep.subr.bf16.mxu1 %v2193_v1 }
  0x46   : > { %1932 = vmatmul.mubr.msk.bf16.vlgmr.msra.gmra.mrb[20].mxu0 %vm316_vm1, %v2320_v8  ;;  %1940 = vmatmul.mubr.msk.bf16.vlgmr.msra.gmra.mrb[20].mxu1 %vm316_vm1, %v2320_v8 }
  0x47   : > { %1945 = vmatprep.mubr.msk.bf16.mxu0 %vm2194_vm0, %v2193_v1  ;;  %1951 = vmatprep.mubr.msk.bf16.mxu1 %vm2194_vm0, %v2193_v1 }
  0xf1   : > { %v354_v27 = vpop.f32.mrb[0].mxu0  ;;  %v406_v28 = vpop.f32.mrb[0].mxu1 }
  0xf2   : > { %v1853_v29 = vpop.f32.mrb[1].mxu0  ;;  %v1861_v30 = vpop.f32.mrb[1].mxu1  ;;  %v964_v55 = vmul.f32 0.17677669, %v354_v27  ;;  %v965_v56 = vmul.f32 0.17677669, %v406_v28 }
  0xf3   : > { %v357_v31 = vpop.f32.mrb[2].mxu0  ;;  %v409_v32 = vpop.f32.mrb[2].mxu1 }
  0xf4   : > { %v1854_v33 = vpop.f32.mrb[3].mxu0  ;;  %v1862_v34 = vpop.f32.mrb[3].mxu1  ;;  %v968_v59 = vpack.c.bf16 %v964_v55, %v964_v55  ;;  %v969_v60 = vpack.c.bf16 %v965_v56, %v965_v56 }
  0xf9   : > { %v458_v35 = vpop.f32.mrb[4].mxu0  ;;  %v510_v36 = vpop.f32.mrb[4].mxu1 }
  0xfa   : > { %v1869_v37 = vpop.f32.mrb[5].mxu0  ;;  %v1877_v38 = vpop.f32.mrb[5].mxu1  ;;  %v966_v8 = vmul.f32 0.17677669, %v458_v35  ;;  %v967_v9 = vmul.f32 0.17677669, %v510_v36 }
  0xfb   : > { %v461_v39 = vpop.f32.mrb[6].mxu0  ;;  %v513_v40 = vpop.f32.mrb[6].mxu1 }
  0xfc   : > { %v1870_v41 = vpop.f32.mrb[7].mxu0  ;;  %v1878_v42 = vpop.f32.mrb[7].mxu1  ;;  %v970_v10 = vpack.c.bf16 %v966_v8, %v966_v8  ;;  %v971_v11 = vpack.c.bf16 %v967_v9, %v967_v9 }
 0x101   : > { %v578_v43 = vpop.f32.mrb[8].mxu0  ;;  %v630_v44 = vpop.f32.mrb[8].mxu1 }
 0x102   : > { %v972_v45 = vpack.c.bf16 %v578_v43, %v578_v43  ;;  %v973_v46 = vpack.c.bf16 %v630_v44, %v630_v44  ;;  %v1885_v47 = vpop.f32.mrb[9].mxu0  ;;  %v1893_v48 = vpop.f32.mrb[9].mxu1 }
 0x103   : > { %v581_v49 = vpop.f32.mrb[10].mxu0  ;;  %v633_v50 = vpop.f32.mrb[10].mxu1 }
 0x104   : > { %v985_v51 = vsel %vm980_vm2, %v972_v45, 0  ;;  %v1031_v52 = vsel %vm980_vm2, %v973_v46, 0  ;;  %v1886_v53 = vpop.f32.mrb[11].mxu0  ;;  %v1894_v54 = vpop.f32.mrb[11].mxu1 }
 0x105   : > { %1944 = vmatpush3.bf16.xpose.msra.mxu0 %v985_v51  ;;  %1950 = vmatpush3.bf16.xpose.msra.mxu1 %v1031_v52 }
 0x106   : > { %1955 = vmatprep.subr.bf16.mxu0 %v2193_v1  ;;  %1961 = vmatprep.subr.bf16.mxu1 %v2193_v1 }
 0x109   : > { %v682_v57 = vpop.f32.mrb[12].mxu0  ;;  %v734_v58 = vpop.f32.mrb[12].mxu1 }
 0x10a   : > { %v974_v61 = vpack.c.bf16 %v682_v57, %v682_v57  ;;  %v975_v62 = vpack.c.bf16 %v734_v58, %v734_v58  ;;  %v1901_v63 = vpop.f32.mrb[13].mxu0  ;;  %v1909_v0 = vpop.f32.mrb[13].mxu1 }
 0x10b   : > { %v685_v2 = vpop.f32.mrb[14].mxu0  ;;  %v737_v3 = vpop.f32.mrb[14].mxu1 }
 0x10c   : > { %v1077_v4 = vsel %vm980_vm2, %v974_v61, 0  ;;  %v1123_v5 = vsel %vm980_vm2, %v975_v62, 0  ;;  %v1902_v6 = vpop.f32.mrb[15].mxu0  ;;  %v1910_v7 = vpop.f32.mrb[15].mxu1  ;;  %1946 = vmatmul.mubr.msk.bf16.vlgmr.msra.gmra.mrb[24].mxu0 %vm980_vm2, %v968_v59  ;;  %1952 = vmatmul.mubr.msk.bf16.vlgmr.msra.gmra.mrb[24].mxu1 %vm980_vm2, %v969_v60 }
 0x10d   : > { %1956 = vmatpush3.bf16.xpose.msra.mxu0 %v1077_v4  ;;  %1962 = vmatpush3.bf16.xpose.msra.mxu1 %v1123_v5 }
 0x10e   : > { %1957 = vmatprep.mubr.msk.bf16.mxu0 %vm2194_vm0, %v2193_v1  ;;  %1963 = vmatprep.mubr.msk.bf16.mxu1 %vm2194_vm0, %v2193_v1 }
 0x10f   : > { %1967 = vmatprep.subr.bf16.mxu0 %v2193_v1  ;;  %1973 = vmatprep.subr.bf16.mxu1 %v2193_v1 }
 0x111   : > { %v802_v12 = vpop.f32.mrb[16].mxu0  ;;  %v854_v13 = vpop.f32.mrb[16].mxu1 }
 0x112   : > { %v976_v14 = vpack.c.bf16 %v802_v12, %v802_v12  ;;  %v977_v15 = vpack.c.bf16 %v854_v13, %v854_v13  ;;  %v1917_v16 = vpop.f32.mrb[17].mxu0  ;;  %v1925_v17 = vpop.f32.mrb[17].mxu1 }
 0x113   : > { %v805_v18 = vpop.f32.mrb[18].mxu0  ;;  %v857_v19 = vpop.f32.mrb[18].mxu1 }
 0x114   : > { %1958 = vmatmul.mubr.msk.bf16.vlgmr.msra.gmra.mrb[28].mxu0 %vm980_vm2, %v970_v10  ;;  %1964 = vmatmul.mubr.msk.bf16.vlgmr.msra.gmra.mrb[28].mxu1 %vm980_vm2, %v971_v11  ;;  %v1209_v20 = vsel %vm1207_vm3, %v976_v14, 0  ;;  %v1255_v21 = vsel %vm1207_vm3, %v977_v15, 0  ;;  %v1918_v22 = vpop.f32.mrb[19].mxu0  ;;  %v1926_v23 = vpop.f32.mrb[19].mxu1 }
 0x115   : > { %1969 = vmatprep.mubr.msk.bf16.mxu0 %vm2194_vm0, %v2193_v1  ;;  %1975 = vmatprep.mubr.msk.bf16.mxu1 %vm2194_vm0, %v2193_v1  ;;  %v1393_v22 = vld [vmem:[%s2633_s4] sm:$0xf]  ;;  %v1394_v23 = vld [vmem:[%s2633_s4 + $0x4] sm:$0xf] }
 0x116   : > { %1968 = vmatpush3.bf16.msra.mxu0 %v1209_v20  ;;  %1974 = vmatpush3.bf16.msra.mxu1 %v1255_v21 }
 0x117   : > { %1979 = vmatprep.subr.bf16.mxu0 %v2193_v1  ;;  %1985 = vmatprep.subr.bf16.mxu1 %v2193_v1 }
 0x119   : > { %v2468_v24 = vpop.f32.mrb[20].mxu0  ;;  %v2470_v25 = vpop.f32.mrb[20].mxu1 }
 0x11a   : > { %v1933_v26 = vpop.f32.mrb[21].mxu0  ;;  %v1941_v27 = vpop.f32.mrb[21].mxu1  ;;  %v978_v12 = vpack.c.bf16 %v2468_v24, %v2468_v24  ;;  %v979_v13 = vpack.c.bf16 %v2470_v25, %v2470_v25 }
 0x11b   : > { %v909_v28 = vpop.f32.mrb[22].mxu0  ;;  %v961_v29 = vpop.f32.mrb[22].mxu1  ;;  %v1401_v26 = vsel %vm1207_vm3, %v1393_v22, 0  ;;  %v1447_v27 = vsel %vm1207_vm3, %v1394_v23, 0 }
 0x11c   : > { %v1934_v30 = vpop.f32.mrb[23].mxu0  ;;  %v1942_v31 = vpop.f32.mrb[23].mxu1  ;;  %v1301_v20 = vsel %vm1207_vm3, %v978_v12, 0  ;;  %v1347_v21 = vsel %vm1207_vm3, %v979_v13, 0  ;;  %v1395_v28 = vld [vmem:[%s2633_s4 + $0x8] sm:$0xf] }
 0x11d   : > { %v1396_v29 = vld [vmem:[%s2633_s4 + $0xc] sm:$0xf] }
 0x1df   : > { %v1021_v32 = vpop.f32.mrb[24].mxu0  ;;  %v1067_v33 = vpop.f32.mrb[24].mxu1 }
 0x1e0   : > { %v1165_v34 = vsel %vm980_vm2, %v1021_v32, -inf  ;;  %v1166_v35 = vsel %vm980_vm2, %v1067_v33, -inf  ;;  %v1947_v36 = vpop.f32.mrb[25].mxu0  ;;  %v1953_v37 = vpop.f32.mrb[25].mxu1 }
 0x1e1   : > { %v1169_v38 = vmax.f32 %v1165_v34, %v1166_v35  ;;  %v1024_v39 = vpop.f32.mrb[26].mxu0  ;;  %v1070_v40 = vpop.f32.mrb[26].mxu1  ;;  %v1493_v36 = vsel %vm1207_vm3, %v1395_v28, 0  ;;  %v1539_v37 = vsel %vm1207_vm3, %v1396_v29, 0 }
 0x1e2   : > { %v1948_v41 = vpop.f32.mrb[27].mxu0  ;;  %v1954_v42 = vpop.f32.mrb[27].mxu1 }
 0x1e7   : > { %v1113_v43 = vpop.f32.mrb[28].mxu0  ;;  %v1159_v44 = vpop.f32.mrb[28].mxu1 }
 0x1e8   : > { %v1167_v45 = vsel %vm980_vm2, %v1113_v43, -inf  ;;  %v1168_v46 = vsel %vm980_vm2, %v1159_v44, -inf  ;;  %v1959_v47 = vpop.f32.mrb[29].mxu0  ;;  %v1965_v48 = vpop.f32.mrb[29].mxu1 }
 0x1e9   : > { %v1170_v49 = vmax.f32 %v1167_v45, %v1168_v46  ;;  %v1116_v50 = vpop.f32.mrb[30].mxu0  ;;  %v1162_v51 = vpop.f32.mrb[30].mxu1 }
 0x1ea   : > { %v1960_v52 = vpop.f32.mrb[31].mxu0  ;;  %v1966_v53 = vpop.f32.mrb[31].mxu1 }
 0x1eb   : > { %v1171_v54 = vmax.f32 %v1169_v38, %v1170_v49 }
 0x1ed   : > { %v1172_v55 = vsub.f32 %v1021_v32, %v1171_v54  ;;  %v1173_v56 = vsub.f32 %v1067_v33, %v1171_v54  ;;  %v1174_v57 = vsub.f32 %v1113_v43, %v1171_v54  ;;  %v1175_v58 = vsub.f32 %v1159_v44, %v1171_v54 }
 0x1ef   : > { %v1176_v59 = vmul.f32 1.442695, %v1172_v55  ;;  %v1178_v60 = vmul.f32 1.442695, %v1173_v56  ;;  %v1180_v61 = vmul.f32 1.442695, %v1174_v57 }
 0x1f0   : > { %v1182_v62 = vmul.f32 1.442695, %v1175_v58 }
 0x1f1   : > { %2087 = vpow2.f32 %v1176_v59 }
 0x1f2   : > { %2089 = vpow2.f32 %v1178_v60 }
 0x1f3   : > { %2091 = vpow2.f32 %v1180_v61 }
 0x1f4   : > { %2093 = vpow2.f32 %v1182_v62 }
 0x1fb   : > { %v2088_v63 = vpop.eup %2087 }
 0x1fc   : > { %v2090_v0 = vpop.eup %2089  ;;  %v1184_v2 = vsel %vm980_vm2, %v2088_v63, 0.0 }
 0x1fd   : > { %v2092_v3 = vpop.eup %2091  ;;  %v1185_v4 = vsel %vm980_vm2, %v2090_v0, 0.0 }
 0x1fe   : > { %v2094_v5 = vpop.eup %2093  ;;  %v1186_v6 = vadd.f32 %v1185_v4, %v1184_v2  ;;  %v1187_v7 = vsel %vm980_vm2, %v2092_v3, 0.0 }
 0x1ff   : > { %v1189_v9 = vsel %vm980_vm2, %v2094_v5, 0.0 }
 0x200   : > { %v1188_v8 = vadd.f32 %v1187_v7, %v1186_v6 }
 0x202   : > { %v1190_v10 = vadd.f32 %v1189_v9, %v1188_v8 }
 0x204   : > { %2095 = vrcp.f32 %v1190_v10 }
 0x20e   : > { %v2096_v11 = vpop.eup %2095 }
 0x20f   : > { %v1195_v14 = vmul.f32 %v2096_v11, %v2094_v5  ;;  %v1192_v15 = vmul.f32 %v2096_v11, %v2088_v63  ;;  %v1193_v16 = vmul.f32 %v2096_v11, %v2090_v0  ;;  %v1194_v17 = vmul.f32 %v2096_v11, %v2092_v3 }
 0x211   : > { %v1200_v18 = vpack.c.bf16 %v1192_v15, %v1192_v15  ;;  %v1201_v19 = vpack.c.bf16 %v1193_v16, %v1193_v16  ;;  %1196 = vst.msk [vmem:[%s2488_s9] sm:$0xff] %vm980_vm2, %v1192_v15  ;;  %1197 = vst.msk [vmem:[%s2488_s9 + $0x8] sm:$0xff] %vm980_vm2, %v1193_v16  ;;  %v1202_v24 = vpack.c.bf16 %v1194_v17, %v1194_v17 }
 0x212   : > { %1198 = vst.msk [vmem:[%s2488_s9 + $0x10] sm:$0xff] %vm980_vm2, %v1194_v17  ;;  %1199 = vst.msk [vmem:[%s2488_s9 + $0x18] sm:$0xff] %vm980_vm2, %v1195_v14  ;;  %v1203_v25 = vpack.c.bf16 %v1195_v14, %v1195_v14  ;;  %s2103_s9 = scalar_lea.vmem %s2102_s17, 1024 }
 0x213   : > { %1970 = vmatmul.mubr.msk.bf16.vlgmr.msra.gmra.mrb[32].mxu0 %vm980_vm2, %v1200_v18  ;;  %1976 = vmatmul.mubr.msk.bf16.vlgmr.msra.gmra.mrb[32].mxu1 %vm980_vm2, %v1201_v19  ;;  %p2105_p1 = scmp.lt.s32.totalorder %s2103_s9, %s2097_s15 }
 0x214   : > { %1980 = vmatpush3.bf16.msra.mxu0 %v1301_v20  ;;  %1986 = vmatpush3.bf16.msra.mxu1 %v1347_v21 }
 0x215   : > { %1981 = vmatprep.mubr.msk.bf16.mxu0 %vm2194_vm0, %v2193_v1  ;;  %1987 = vmatprep.mubr.msk.bf16.mxu1 %vm2194_vm0, %v2193_v1  ;;  %p2106_p2 = por %p2105_p1, %p2104_p0 }
 0x216   : > { %1991 = vmatprep.subr.bf16.mxu0 %v2193_v1  ;;  %1997 = vmatprep.subr.bf16.mxu1 %v2193_v1 }
 0x217   : > { %p2107_p3 = pnand %p2106_p2, %p2100_p13 }
 0x21b   : > { %1982 = vmatmul.mubr.msk.bf16.vlgmr.msra.gmra.mrb[36].mxu0 %vm980_vm2, %v1202_v24  ;;  %1988 = vmatmul.mubr.msk.bf16.vlgmr.msra.gmra.mrb[36].mxu1 %vm980_vm2, %v1203_v25 }
 0x21c   : > { %1992 = vmatpush3.bf16.msra.mxu0 %v1401_v26  ;;  %1998 = vmatpush3.bf16.msra.mxu1 %v1447_v27 }
 0x21d   : > { %1993 = vmatprep.mubr.msk.bf16.mxu0 %vm2194_vm0, %v2193_v1  ;;  %1999 = vmatprep.mubr.msk.bf16.mxu1 %vm2194_vm0, %v2193_v1 }
 0x21e   : > { %2003 = vmatprep.subr.bf16.mxu0 %v2193_v1  ;;  %2009 = vmatprep.subr.bf16.mxu1 %v2193_v1 }
 0x2e6   : > { %v1245_v30 = vpop.f32.mrb[32].mxu0  ;;  %v1291_v31 = vpop.f32.mrb[32].mxu1 }
 0x2e7   : > { %v1389_v32 = vpack.c.bf16 %v1245_v30, %v1245_v30  ;;  %v1390_v33 = vpack.c.bf16 %v1291_v31, %v1291_v31  ;;  %v1971_v34 = vpop.f32.mrb[33].mxu0  ;;  %v1977_v35 = vpop.f32.mrb[33].mxu1 }
 0x2e8   : > { %v1248_v38 = vpop.f32.mrb[34].mxu0  ;;  %v1294_v39 = vpop.f32.mrb[34].mxu1 }
 0x2e9   : > { %v1972_v40 = vpop.f32.mrb[35].mxu0  ;;  %v1978_v41 = vpop.f32.mrb[35].mxu1  ;;  %1994 = vmatmul.mubr.msk.bf16.vlgmr.msra.gmra.mrb[40].mxu0 %vm980_vm2, %v1389_v32  ;;  %2000 = vmatmul.mubr.msk.bf16.vlgmr.msra.gmra.mrb[40].mxu1 %vm980_vm2, %v1390_v33 }
 0x2ea   : > { %2004 = vmatpush3.bf16.msra.mxu0 %v1493_v36  ;;  %2010 = vmatpush3.bf16.msra.mxu1 %v1539_v37 }
 0x2eb   : > { %2005 = vmatprep.mubr.msk.bf16.mxu0 %vm2194_vm0, %v2193_v1  ;;  %2011 = vmatprep.mubr.msk.bf16.mxu1 %vm2194_vm0, %v2193_v1 }
 0x2ee   : > { %v1337_v42 = vpop.f32.mrb[36].mxu0  ;;  %v1383_v43 = vpop.f32.mrb[36].mxu1 }
 0x2ef   : > { %v1391_v44 = vpack.c.bf16 %v1337_v42, %v1337_v42  ;;  %v1392_v45 = vpack.c.bf16 %v1383_v43, %v1383_v43  ;;  %v1983_v46 = vpop.f32.mrb[37].mxu0  ;;  %v1989_v47 = vpop.f32.mrb[37].mxu1 }
 0x2f0   : > { %v1340_v48 = vpop.f32.mrb[38].mxu0  ;;  %v1386_v49 = vpop.f32.mrb[38].mxu1 }
 0x2f1   : > { %v1984_v50 = vpop.f32.mrb[39].mxu0  ;;  %v1990_v51 = vpop.f32.mrb[39].mxu1  ;;  %2006 = vmatmul.mubr.msk.bf16.vlgmr.msra.gmra.mrb[44].mxu0 %vm980_vm2, %v1391_v44  ;;  %2012 = vmatmul.mubr.msk.bf16.vlgmr.msra.gmra.mrb[44].mxu1 %vm980_vm2, %v1392_v45 }
 0x2f2   : > { %2110 = shalt.err (!%p2107_p3)
}
 0x2f3   : > { %s2111_s18 = scalar_lea.hbm %s2547_s13, 512  ;;  %s2115_s22 = scalar_lea.hbm %s2636_s7, 1024 }
 0x2f4   : > { %p2112_p4 = scmp.ne.s32.totalorder %s2547_s13, %s2111_s18  ;;  %p2116_p9 = scmp.lt.u32.totalorder %s2547_s13, %s2636_s7 }
 0x2f5   : > { %p2117_p10 = scmp.lt.u32.totalorder %s2115_s22, %s2111_s18  ;;  %p2119_p12 = scmp.lt.u32.totalorder %s2111_s18, %s2547_s13 }
 0x2f6   : > { %p2113_p7 = pnand %p2112_p4, %p2277_p5 }
 0x2f7   : > { %p2118_p11 = por %p2117_p10, %p2116_p9 }
 0x2f8   : > { %p2114_p8 = pneg %p2113_p7 }
 0x2f9   : > { %p2120_p13 = por %p2119_p12, %p2118_p11 }
 0x2fb   : > { %p2121_p0 = pnand %p2120_p13, %p2114_p8 }
 0x2fd   : > { %2124 = shalt.err (!%p2121_p0)
}
 0x2fe   : > { %s2196_s15 = smov 128   ;;  %s2197_s16 = smov 8   ;;  %v1778_v5 = vld [vmem:[%s2634_s5] ss:$0 sm:$0xff] }
 0x2ff   : > { %2016 = dma.vmem_to_hbm [thread:$0]  (%p2277_p5), %s2542_s21, 512, %s2547_s13, %s1603_s14, %s2196_s15, %s2196_s15, %s2197_s16  }
 0x300   : > { %s1727_s17 = sshll.u32 %s2481_s29, 3  ;;  %s1781_s14 = sshll.u32 %s2260_s28, 7 }
 0x301   : > { %s273_s9 = scalar_lea.vmem [#allocation2], %s1727_s17  ;;  %s2585_s22 = scalar_lea.hbm %s2635_s6, %s1781_s14 }
 0x302   : > { %s1616_s18 = sshll.u32 %s273_s9, 4  ;;  %s1598_s23 = scalar_lea.sflag [#allocation3], %s2481_s29  ;;  %s2587_s18 = int_to_ptr.vmem [resolvable:$true] %s1616_s18 }
 0x303   : > { %s2125_s8 = scalar_lea.vmem %s2587_s18, 128  ;;  %s2198_s28 = smov [#allocation2]  }
 0x304   : > { %p2126_p1 = scmp.ne.s32.totalorder %s2587_s18, %s2125_s8  ;;  %s2129_s15 = sshll.u32 %s2198_s28, 4  ;;  %s2130_s15 = int_to_ptr.vmem [resolvable:$false] %s2129_s15 }
 0x305   : > { %s2131_s16 = scalar_lea.vmem %s2130_s15, 256  ;;  %p2132_p4 = scmp.lt.s32.totalorder %s2587_s18, %s2130_s15 }
 0x306   : > { %p2127_p2 = pnand %p2126_p1, %p2277_p5  ;;  %p2133_p7 = scmp.lt.s32.totalorder %s2131_s16, %s2125_s8 }
 0x308   : > { %p2128_p3 = pneg %p2127_p2  ;;  %p2134_p8 = por %p2133_p7, %p2132_p4 }
 0x30a   : > { %p2135_p9 = pnand %p2134_p8, %p2128_p3 }
 0x3bc   : > { %v1437_v1 = vpop.f32.mrb[40].mxu0  ;;  %v1483_v52 = vpop.f32.mrb[40].mxu1 }
 0x3bd   : > { %v1581_v53 = vsel %vm316_vm1, %v1437_v1, 0.0  ;;  %v1582_v54 = vsel %vm316_vm1, %v1483_v52, 0.0  ;;  %v1995_v55 = vpop.f32.mrb[41].mxu0  ;;  %v2001_v56 = vpop.f32.mrb[41].mxu1 }
 0x3be   : > { %v1583_v57 = vadd.f32 %v1582_v54, %v1581_v53  ;;  %v1440_v58 = vpop.f32.mrb[42].mxu0  ;;  %v1486_v59 = vpop.f32.mrb[42].mxu1 }
 0x3bf   : > { %v1996_v60 = vpop.f32.mrb[43].mxu0  ;;  %v2002_v61 = vpop.f32.mrb[43].mxu1 }
 0x3c4   : > { %v1529_v62 = vpop.f32.mrb[44].mxu0  ;;  %v1575_v63 = vpop.f32.mrb[44].mxu1 }
 0x3c5   : > { %v1584_v0 = vsel %vm316_vm1, %v1529_v62, 0.0  ;;  %v2007_v2 = vpop.f32.mrb[45].mxu0  ;;  %v2013_v3 = vpop.f32.mrb[45].mxu1  ;;  %v1586_v8 = vsel %vm316_vm1, %v1575_v63, 0.0 }
 0x3c6   : > { %v1585_v4 = vadd.f32 %v1584_v0, %v1583_v57  ;;  %v1532_v6 = vpop.f32.mrb[46].mxu0  ;;  %v1578_v7 = vpop.f32.mrb[46].mxu1 }
 0x3c7   : > { %v2008_v9 = vpop.f32.mrb[47].mxu0  ;;  %v2014_v10 = vpop.f32.mrb[47].mxu1 }
 0x3c8   : > { %v1587_v11 = vadd.f32 %v1586_v8, %v1585_v4 }
 0x3ca   : > { %v1595_v12 = vadd.f32 %v1778_v5, %v1587_v11 }
 0x3cc   : > { %1596 = vst.msk [vmem:[%s273_s9] sm:$0xff] %vm316_vm1, %v1595_v12 }
 0x3cd   : > { %2138 = shalt.err (!%p2135_p9)
}
 0x3ce   : > { %s2139_s29 = scalar_lea.hbm %s2585_s22, 128  ;;  %s2143_s13 = scalar_lea.hbm %s2635_s6, 256 }
 0x3cf   : > { %p2140_p10 = scmp.ne.s32.totalorder %s2585_s22, %s2139_s29  ;;  %p2144_p13 = scmp.lt.u32.totalorder %s2585_s22, %s2635_s6 }
 0x3d0   : > { %p2145_p0 = scmp.lt.u32.totalorder %s2143_s13, %s2139_s29  ;;  %p2147_p2 = scmp.lt.u32.totalorder %s2139_s29, %s2585_s22 }
 0x3d1   : > { %p2141_p11 = pnand %p2140_p10, %p2277_p5 }
 0x3d2   : > { %p2146_p1 = por %p2145_p0, %p2144_p13 }
 0x3d3   : > { %p2142_p12 = pneg %p2141_p11 }
 0x3d4   : > { %p2148_p3 = por %p2147_p2, %p2146_p1 }
 0x3d6   : > { %p2149_p4 = pnand %p2148_p3, %p2142_p12 }
 0x3d8   : > { %2152 = shalt.err (!%p2149_p4)
}
 0x3d9   : > { %2015 = dma.vmem_to_hbm [thread:$0]  (%p2277_p5), %s2587_s18, 128, %s2585_s22, %s1598_s23  }
 0x3da PF: > { %p2026_p7 = scmp.ge.s32.totalorder %s2191_s27, 2  ;;  %s1644_s19 = sand.u32 1, %s2179_s24  }
 0x3db   : > { %s1645_s20 = scalar_lea.sflag [#allocation3], %s1644_s19 }
 0x3dc   : > { %p2020_p8 = pnand %p2026_p7, %p2281_p6 }
 0x3de   : > { %2170 = dma.done.wait (!%p2020_p8), %s1645_s20, 128  }
 0x3df   : > { %2172 = vsyncadd (!%p2020_p8), %s1645_s20, 4294967168  ;;  %s1654_s8 = scalar_lea.sflag [#allocation5], %s1644_s19 }
 0x3e0   : > { %2174 = dma.done.wait (!%p2020_p8), %s1654_s8, 512  }
 0x3e1   : > { %2176 = vsyncadd (!%p2020_p8), %s1654_s8, 4294966784  ;;  %p21_p5 = scmp.ge.s32.totalorder %s2264_s30, 4   ;;  %s2639_s24 = smov %s2183_s25 }
 0x3e2   : > { %s2640_s25 = smov %s2187_s26  ;;  %s2641_s26 = smov %s2275_s10 }
 0x3e3   : > { %s2642_s27 = smov %s2264_s30  ;;  %23 = sbr.rel (!%p21_p5) target bundleno = 5 (0x5), region = 96 }
 0x3ea   :  { %1659 = vsyncpa [#allocation3], 1 }
 0x3eb   :  { %1661 = vsyncpa [#allocation3 + $0x1], 1 }
 0x3ec   :  { %1662 = vsyncpa [#allocation5], 1 }
 0x3ed   :  { %1664 = vsyncpa [#allocation5 + $0x1], 1 }

</bundles_post_ra>
